<compile_context>
chip_gen: v5e
topology: v5e:2x2
jax: 0.10.0
libtpu: 0.0.40
codegen_flags: <defaults>
</compile_context>

<pallas_src>
import functools

import jax
import jax.numpy as jnp
from jax.experimental import pallas as pl
from jax.experimental.pallas import tpu as pltpu


def crossnet_kernel(feat_ref, cross_ref, w_ref, wb_ref, b_ref, out_ref, *, num_layers):
    """Runs all cross layers sequentially on one (TB, D) batch tile.

    feat_ref  : [TB, D] VMEM   - x_l tile (updated each layer)
    cross_ref : [TB, D] VMEM   - x_0 tile (constant across layers)
    w_ref     : [L,  D] VMEM f32 - weight_w[i] linear weights (D -> 1), resident
    wb_ref    : [L]     SMEM f32 - weight_w[i] linear biases (scalar per layer)
    b_ref     : [L,  D] VMEM f32 - weight_b[i] additive bias vectors, resident
    out_ref   : [TB, D] VMEM   - final feat tile
    """
    # Hoist the L scalar SMEM reads before the vector loop body.
    wb_vals = [wb_ref[i] for i in range(num_layers)]

    feat = feat_ref[...].astype(jnp.float32)
    cross = cross_ref[...].astype(jnp.float32)
    # num_layers is small & static -> unrolled Python loop.  For large L or
    # large D, the per-layer reduce could be moved onto the MXU via
    # lax.dot_general; at current sizes the kernel is HBM-bound so the
    # VPU+XLU path hides entirely under DMA.
    for i in range(num_layers):
        w_i = w_ref[i, :].astype(jnp.float32)                 # [D]
        # per-sample scalar: feat @ w_i + wb_i   -> [TB, 1]
        s = jnp.sum(feat * w_i[None, :], axis=-1, keepdims=True) + wb_vals[i]
        b_i = b_ref[i, :].astype(jnp.float32)[None, :]        # [1, D]
        feat = cross * s + b_i + feat
    # TODO(synk): BatchNorm1d branch (block_option.batchnorm == True) not implemented.
    out_ref[...] = feat.astype(out_ref.dtype)


def _round_up(x, m):
    return (x + m - 1) // m * m


def crossnet_forward(feat, cross_feat, W, wb, b, emb_W=None, emb_b=None, *,
                     io_dtype=None, block_rows=None, target_tile_bytes=2 << 20):
    """Wrapper matching CrossNetBlock.forward on already-concatenated features.

    io_dtype    : optional HBM streaming dtype (e.g. jnp.bfloat16) for feat /
                  cross_feat / output.  Compute stays f32 inside the kernel.
    block_rows  : optional cap on the batch tile (testing / VMEM tuning).
    """
    B, D = feat.shape
    if cross_feat.shape[1] != D:
        # emb_layer = nn.Linear(cross_num_input_feat, num_input_feat)  (glue matmul)
        cross_feat = cross_feat @ emb_W.T + emb_b

    L = W.shape[0]
    io_dtype = jnp.dtype(io_dtype) if io_dtype is not None else jnp.dtype(feat.dtype)
    itemsize = io_dtype.itemsize

    # Streamed arrays in the (possibly reduced-precision) I/O dtype.
    feat_io = feat.astype(io_dtype)
    cross_io = cross_feat.astype(io_dtype)
    # Weights in f32 (SMEM scalars are 32-bit; also keeps v5e compute exact).
    W32 = W.astype(jnp.float32)
    wb32 = wb.astype(jnp.float32)
    b32 = b.astype(jnp.float32)

    # --- batch tile sizing ---------------------------------------------------
    # Target ~target_tile_bytes per streamed buffer so pipelined DMA reaches the
    # HBM-roofline plateau and the ~0.35us/step overhead is amortized.
    per_row = max(1, D * itemsize)
    TB = max(16, (target_tile_bytes // per_row) // 16 * 16)
    if block_rows is not None:
        TB = min(TB, max(16, (block_rows // 16) * 16))
    # Megacore: guarantee >= 2 grid steps when the batch is big enough, so the
    # "parallel" batch axis actually splits across the two TensorCores on v7x.
    if B > 16 and pl.cdiv(B, TB) < 2:
        TB = _round_up(pl.cdiv(B, 2), 16)
    if TB >= B:
        TB = B  # single full-extent batch block (always a legal block shape)
    grid = (pl.cdiv(B, TB),)

    # --- VMEM budget ---------------------------------------------------------
    # 2 buffers x 3 streams (feat, cross, out) + resident weights + slack.
    est_vmem = 2 * 3 * TB * D * itemsize + 2 * L * D * 4 + 4 * L + (1 << 20)
    vmem_limit = int(min(48 << 20, max(32 << 20, 2 * est_vmem)))

    kernel = functools.partial(crossnet_kernel, num_layers=L)

    # Advisory cost: ~5 flops per element per layer; HBM traffic is 3 streams.
    cost = pl.CostEstimate(
        flops=int(5 * L * B * D),
        transcendentals=0,
        bytes_accessed=int(3 * B * D * itemsize + 2 * L * D * 4 + L * 4),
    )

    out = pl.pallas_call(
        kernel,
        out_shape=jax.ShapeDtypeStruct((B, D), io_dtype),
        grid=grid,
        in_specs=[
            pl.BlockSpec((TB, D), lambda i: (i, 0)),                # feat tile
            pl.BlockSpec((TB, D), lambda i: (i, 0)),                # cross tile
            pl.BlockSpec((L, D), lambda i: (0, 0)),                 # W resident
            pl.BlockSpec(memory_space=pltpu.MemorySpace.SMEM),      # wb scalars
            pl.BlockSpec((L, D), lambda i: (0, 0)),                 # b resident
        ],
        out_specs=pl.BlockSpec((TB, D), lambda i: (i, 0)),
        # Output is an updated feat of identical shape/dtype -> reuse its buffer.
        input_output_aliases={0: 0},
        compiler_params=pltpu.CompilerParams(
            dimension_semantics=("parallel",),            # megacore on v7x
            vmem_limit_bytes=vmem_limit,
        ),
        cost_estimate=cost,
    )(feat_io, cross_io, W32, wb32, b32)

    return out


def crossnet_reference(feat, cross_feat, W, wb, b):
    """Plain-JAX reference mirroring the PyTorch forward loop."""
    x = feat
    for i in range(W.shape[0]):
        s = x @ W[i] + wb[i]                     # [B]
        x = cross_feat * s[:, None] + b[i][None, :] + x
    return x


if __name__ == "__main__":
    key = jax.random.PRNGKey(0)
    keys = jax.random.split(key, 14)

    # ---------------------------------------------------------------------
    # Shared small cross-net params (num_input_feat == cross_num_input_feat)
    # ---------------------------------------------------------------------
    D, L = 32, 3
    bound = 1.0 / jnp.sqrt(jnp.float32(D))
    # nn.Linear(D, 1)-style init: uniform(-1/sqrt(D), 1/sqrt(D))
    W = jax.random.uniform(keys[0], (L, D), jnp.float32, -bound, bound)
    wb = jax.random.uniform(keys[1], (L,), jnp.float32, -bound, bound)
    b = 0.01 * jax.random.normal(keys[2], (L, D), dtype=jnp.float32)

    # Case 1: tiny ragged batch (B=10) -> single full-extent block, no padding.
    B1 = 10
    feat1 = jax.random.normal(keys[3], (B1, D), dtype=jnp.float32)
    cross1 = jax.random.normal(keys[4], (B1, D), dtype=jnp.float32)
    ref1 = crossnet_reference(feat1, cross1, W, wb, b)
    out1 = jax.block_until_ready(crossnet_forward(feat1, cross1, W, wb, b))
    assert out1.shape == (B1, D)
    assert jnp.allclose(out1, ref1, atol=1e-5, rtol=1e-5), "mismatch vs reference (case 1)"

    # Case 2: multi-step ragged grid (B=200, 64-row tiles -> 4 steps, last = 8
    # rows masked) -> exercises pipelined batch tiling + resident weights +
    # masked writeback of the ragged tail.
    B2 = 200
    feat2 = jax.random.normal(keys[5], (B2, D), dtype=jnp.float32)
    cross2 = jax.random.normal(keys[6], (B2, D), dtype=jnp.float32)
    ref2 = crossnet_reference(feat2, cross2, W, wb, b)
    out2 = jax.block_until_ready(
        crossnet_forward(feat2, cross2, W, wb, b, block_rows=64))
    assert out2.shape == (B2, D)
    assert jnp.allclose(out2, ref2, atol=1e-5, rtol=1e-5), "mismatch vs reference (case 2)"

    # Case 3: cross_num_input_feat != num_input_feat (emb_layer glue matmul),
    # lane-dense D=256, bf16 I/O, and a 2-step grid (B=128 -> 2 x 64 rows) so
    # the "parallel" batch axis splits across TensorCores.
    D3, Dc3, B3 = 256, 192, 128
    bound3 = 1.0 / jnp.sqrt(jnp.float32(D3))
    W3 = jax.random.uniform(keys[7], (L, D3), jnp.float32, -bound3, bound3)
    wb3 = jax.random.uniform(keys[8], (L,), jnp.float32, -bound3, bound3)
    b3 = 0.01 * jax.random.normal(keys[9], (L, D3), dtype=jnp.float32)
    emb_bound = 1.0 / jnp.sqrt(jnp.float32(Dc3))
    emb_W = jax.random.uniform(keys[10], (D3, Dc3), jnp.float32, -emb_bound, emb_bound)
    emb_b = jax.random.uniform(keys[11], (D3,), jnp.float32, -emb_bound, emb_bound)
    feat3 = jax.random.normal(keys[12], (B3, D3), dtype=jnp.float32)
    cross3 = jax.random.normal(keys[13], (B3, Dc3), dtype=jnp.float32)

    cross3_emb = cross3 @ emb_W.T + emb_b
    # Reference on the bf16-rounded streamed inputs (kernel computes in f32).
    ref3 = crossnet_reference(
        feat3.astype(jnp.bfloat16).astype(jnp.float32),
        cross3_emb.astype(jnp.bfloat16).astype(jnp.float32),
        W3, wb3, b3)
    out3 = jax.block_until_ready(
        crossnet_forward(feat3, cross3, W3, wb3, b3, emb_W, emb_b,
                         io_dtype=jnp.bfloat16))
    assert out3.shape == (B3, D3)
    assert out3.dtype == jnp.bfloat16
    assert jnp.allclose(out3.astype(jnp.float32), ref3, atol=1e-1, rtol=5e-2), \
        "mismatch vs reference (case 3, bf16 I/O)"

    print("KERNEL_OK")
</pallas_src>

<mosaic_0001>
module attributes {stable_mosaic.version = 11 : i64} {
  func.func @crossnet_kernel(%arg0: i32, %arg1: memref<10x32xf32, #tpu.memory_space<vmem>>, %arg2: memref<10x32xf32, #tpu.memory_space<vmem>>, %arg3: memref<3x32xf32, #tpu.memory_space<vmem>>, %arg4: memref<3xf32, #tpu.memory_space<smem>>, %arg5: memref<3x32xf32, #tpu.memory_space<vmem>>, %arg6: memref<10x32xf32, #tpu.memory_space<vmem>>) attributes {dimension_semantics = [#tpu.dimension_semantics<parallel>], iteration_bounds = array<i64: 1>, scalar_prefetch = 0 : i64, scratch_operands = 0 : i64, tpu.core_type = #tpu.core_type<tc>, window_params = [{transform_indices = @transform_0, window_bounds = array<i64: 10, 32>}, {transform_indices = @transform_1, window_bounds = array<i64: 10, 32>}, {pipeline_mode = #tpu.pipeline_mode<synchronous>, transform_indices = @transform_2, window_bounds = array<i64: 3, 32>}, {transform_indices = @transform_3, window_bounds = array<i64: 3>}, {pipeline_mode = #tpu.pipeline_mode<synchronous>, transform_indices = @transform_4, window_bounds = array<i64: 3, 32>}, {transform_indices = @transform_5, window_bounds = array<i64: 10, 32>}]} {
    %c0 = arith.constant 0 : index
    %0 = memref.load %arg4[%c0] : memref<3xf32, #tpu.memory_space<smem>>
    %c1 = arith.constant 1 : index
    %1 = memref.load %arg4[%c1] : memref<3xf32, #tpu.memory_space<smem>>
    %c2 = arith.constant 2 : index
    %2 = memref.load %arg4[%c2] : memref<3xf32, #tpu.memory_space<smem>>
    %c0_0 = arith.constant 0 : index
    %c0_1 = arith.constant 0 : index
    %3 = vector.load %arg1[%c0_0, %c0_1] : memref<10x32xf32, #tpu.memory_space<vmem>>, vector<10x32xf32>
    %c0_2 = arith.constant 0 : index
    %c0_3 = arith.constant 0 : index
    %4 = vector.load %arg2[%c0_2, %c0_3] : memref<10x32xf32, #tpu.memory_space<vmem>>, vector<10x32xf32>
    %c0_4 = arith.constant 0 : index
    %c0_5 = arith.constant 0 : index
    %5 = vector.load %arg3[%c0_4, %c0_5] : memref<3x32xf32, #tpu.memory_space<vmem>>, vector<1x32xf32>
    %6 = vector.shape_cast %5 : vector<1x32xf32> to vector<32xf32>
    %7 = vector.shape_cast %6 : vector<32xf32> to vector<1x32xf32>
    %8 = vector.broadcast %7 : vector<1x32xf32> to vector<10x32xf32>
    %9 = arith.mulf %3, %8 : vector<10x32xf32>
    %cst = arith.constant dense<0.000000e+00> : vector<10xf32>
    %10 = vector.multi_reduction <add>, %9, %cst [1] : vector<10x32xf32> to vector<10xf32>
    %11 = vector.shape_cast %10 : vector<10xf32> to vector<10x1xf32>
    %12 = vector.broadcast %0 : f32 to vector<10x1xf32>
    %13 = arith.addf %11, %12 : vector<10x1xf32>
    %c0_6 = arith.constant 0 : index
    %c0_7 = arith.constant 0 : index
    %14 = vector.load %arg5[%c0_6, %c0_7] : memref<3x32xf32, #tpu.memory_space<vmem>>, vector<1x32xf32>
    %15 = vector.shape_cast %14 : vector<1x32xf32> to vector<32xf32>
    %16 = vector.shape_cast %15 : vector<32xf32> to vector<1x32xf32>
    %17 = vector.broadcast %13 : vector<10x1xf32> to vector<10x32xf32>
    %18 = arith.mulf %4, %17 : vector<10x32xf32>
    %19 = vector.broadcast %16 : vector<1x32xf32> to vector<10x32xf32>
    %20 = arith.addf %18, %19 : vector<10x32xf32>
    %21 = arith.addf %20, %3 : vector<10x32xf32>
    %c1_8 = arith.constant 1 : index
    %c0_9 = arith.constant 0 : index
    %22 = vector.load %arg3[%c1_8, %c0_9] : memref<3x32xf32, #tpu.memory_space<vmem>>, vector<1x32xf32>
    %23 = vector.shape_cast %22 : vector<1x32xf32> to vector<32xf32>
    %24 = vector.shape_cast %23 : vector<32xf32> to vector<1x32xf32>
    %25 = vector.broadcast %24 : vector<1x32xf32> to vector<10x32xf32>
    %26 = arith.mulf %21, %25 : vector<10x32xf32>
    %cst_10 = arith.constant dense<0.000000e+00> : vector<10xf32>
    %27 = vector.multi_reduction <add>, %26, %cst_10 [1] : vector<10x32xf32> to vector<10xf32>
    %28 = vector.shape_cast %27 : vector<10xf32> to vector<10x1xf32>
    %29 = vector.broadcast %1 : f32 to vector<10x1xf32>
    %30 = arith.addf %28, %29 : vector<10x1xf32>
    %c1_11 = arith.constant 1 : index
    %c0_12 = arith.constant 0 : index
    %31 = vector.load %arg5[%c1_11, %c0_12] : memref<3x32xf32, #tpu.memory_space<vmem>>, vector<1x32xf32>
    %32 = vector.shape_cast %31 : vector<1x32xf32> to vector<32xf32>
    %33 = vector.shape_cast %32 : vector<32xf32> to vector<1x32xf32>
    %34 = vector.broadcast %30 : vector<10x1xf32> to vector<10x32xf32>
    %35 = arith.mulf %4, %34 : vector<10x32xf32>
    %36 = vector.broadcast %33 : vector<1x32xf32> to vector<10x32xf32>
    %37 = arith.addf %35, %36 : vector<10x32xf32>
    %38 = arith.addf %37, %21 : vector<10x32xf32>
    %c2_13 = arith.constant 2 : index
    %c0_14 = arith.constant 0 : index
    %39 = vector.load %arg3[%c2_13, %c0_14] : memref<3x32xf32, #tpu.memory_space<vmem>>, vector<1x32xf32>
    %40 = vector.shape_cast %39 : vector<1x32xf32> to vector<32xf32>
    %41 = vector.shape_cast %40 : vector<32xf32> to vector<1x32xf32>
    %42 = vector.broadcast %41 : vector<1x32xf32> to vector<10x32xf32>
    %43 = arith.mulf %38, %42 : vector<10x32xf32>
    %cst_15 = arith.constant dense<0.000000e+00> : vector<10xf32>
    %44 = vector.multi_reduction <add>, %43, %cst_15 [1] : vector<10x32xf32> to vector<10xf32>
    %45 = vector.shape_cast %44 : vector<10xf32> to vector<10x1xf32>
    %46 = vector.broadcast %2 : f32 to vector<10x1xf32>
    %47 = arith.addf %45, %46 : vector<10x1xf32>
    %c2_16 = arith.constant 2 : index
    %c0_17 = arith.constant 0 : index
    %48 = vector.load %arg5[%c2_16, %c0_17] : memref<3x32xf32, #tpu.memory_space<vmem>>, vector<1x32xf32>
    %49 = vector.shape_cast %48 : vector<1x32xf32> to vector<32xf32>
    %50 = vector.shape_cast %49 : vector<32xf32> to vector<1x32xf32>
    %51 = vector.broadcast %47 : vector<10x1xf32> to vector<10x32xf32>
    %52 = arith.mulf %4, %51 : vector<10x32xf32>
    %53 = vector.broadcast %50 : vector<1x32xf32> to vector<10x32xf32>
    %54 = arith.addf %52, %53 : vector<10x32xf32>
    %55 = arith.addf %54, %38 : vector<10x32xf32>
    %c0_18 = arith.constant 0 : index
    %c0_19 = arith.constant 0 : index
    %56 = vector.load %arg6[%c0_18, %c0_19] : memref<10x32xf32, #tpu.memory_space<vmem>>, vector<10x32xf32>
    tpu.vector_store %arg6[%c0_18, %c0_19], %55 {strides = array<i32>} : memref<10x32xf32, #tpu.memory_space<vmem>>, vector<10x32xf32>,
    return
  }
  func.func @transform_0(%arg0: i32) -> (i32, i32) {
    %c0_i32 = arith.constant 0 : i32
    %c0_i32_0 = arith.constant 0 : i32
    return %arg0, %c0_i32 : i32, i32
  }
  func.func @transform_1(%arg0: i32) -> (i32, i32) {
    %c0_i32 = arith.constant 0 : i32
    %c0_i32_0 = arith.constant 0 : i32
    return %arg0, %c0_i32 : i32, i32
  }
  func.func @transform_2(%arg0: i32) -> (i32, i32) {
    %c0_i32 = arith.constant 0 : i32
    %c0_i32_0 = arith.constant 0 : i32
    %c0_i32_1 = arith.constant 0 : i32
    return %c0_i32, %c0_i32_0 : i32, i32
  }
  func.func @transform_3(%arg0: i32) -> i32 {
    %c0_i32 = arith.constant 0 : i32
    %c0_i32_0 = arith.constant 0 : i32
    return %c0_i32 : i32
  }
  func.func @transform_4(%arg0: i32) -> (i32, i32) {
    %c0_i32 = arith.constant 0 : i32
    %c0_i32_0 = arith.constant 0 : i32
    %c0_i32_1 = arith.constant 0 : i32
    return %c0_i32, %c0_i32_0 : i32, i32
  }
  func.func @transform_5(%arg0: i32) -> (i32, i32) {
    %c0_i32 = arith.constant 0 : i32
    %c0_i32_0 = arith.constant 0 : i32
    return %arg0, %c0_i32 : i32, i32
  }
}

</mosaic_0001>

<bundles_post_ra>
// kernel: tpu_custom_call.1
= control target key start
LH: loop header
LB: loop body
LE: loop exit
PB: predicated region body
PF: predicated region fallthrough
CT: control target
= control target key end

     0   :  { %10 = vsyncpa [#allocation3], 0  ;;  %s305_s0 = inlined_call_operand.hbm [shape: f32[10,32], index: 0, kind: input, shape index: {}, may-alias: {0,5}]   ;;  %s306_s1 = inlined_call_operand.vmem [shape: f32[10,32], index: 1, kind: input, shape index: {}]   ;;  %s307_s2 = inlined_call_operand.vmem [shape: f32[3,32], index: 2, kind: input, shape index: {}]   ;;  %s308_s3 = inlined_call_operand.vmem [shape: f32[3], index: 3, kind: input, shape index: {}]   ;;  %s309_s4 = inlined_call_operand.vmem [shape: f32[3,32], index: 4, kind: input, shape index: {}]   ;;  %s310_s5 = inlined_call_operand.hbm [shape: f32[10,32], index: 5, kind: output, shape index: {}, may-alias: {0,5}]  }
   0x1   :  { %11 = vsyncpa [#allocation5], 0 }
   0x2   :  { %12 = vsyncpa [#allocation4], 0  ;;  %s17_s20 = sshll.u32 %s305_s0, 4  ;;  %s223_s21 = smov [#allocation2]   ;;  %s18_s20 = int_to_ptr.hbm [resolvable:$true] %s17_s20 }
   0x3   :  { %s19_s22 = sshll.u32 %s223_s21, 4  ;;  %s35_s25 = sshll.u32 %s308_s3, 4  ;;  %s20_s22 = int_to_ptr.vmem [resolvable:$true] %s19_s22  ;;  %s36_s25 = int_to_ptr.vmem [resolvable:$true] %s35_s25 }
   0x4   :  { %s224_s26 = smov 128   ;;  %s225_s27 = smov 8  }
   0x5   :  { %25 = dma.hbm_to_vmem [thread:$0]  %s18_s20, 256, %s20_s22, [#allocation3], %s224_s26, %s224_s26, %s225_s27  }
   0x6   :  { %s226_s28 = smov [#allocation6]  }
   0x7   :  { %38 = dma.vmem_to_smem %s36_s25, 16, %s226_s28, [#allocation5]  }
   0x8   :  { %217 = dma.done.wait [#allocation3], 256  }
   0x9   :  { %218 = vsyncadd [#allocation3], 4294967040 }
   0xa   :  { %219 = dma.done.wait [#allocation5], 16  }
   0xb   :  { %220 = vsyncadd [#allocation5], 4294967280 }
   0xc   :  { %49 = sfence }
   0xd   :  { %v53_v0 = vld [vmem:[#allocation2] sm:$0xff]  ;;  %vm61_vm0 = vcmask 261120   ;;  %v54_v3 = vld [vmem:[#allocation2 + $0x8] sm:$0x3]  ;;  %vm65_vm1 = vcmask 254976   ;;  %s50_s3 = sld [smem:[#allocation6]] }
   0xe   :  { %v151_v1 = vld [vmem:[%s307_s2] ss:$0 sm:$0xff]  ;;  %v153_v14 = vld [vmem:[%s307_s2 + $0x1] ss:$0 sm:$0xff]  ;;  %v56_v16 = vld [vmem:[%s306_s1 + $0x8] sm:$0x3] }
   0xf   :  { %v59_v2 = vmul.f32 %v151_v1, %v53_v0  ;;  %v60_v5 = vmul.f32 %v151_v1, %v54_v3  ;;  %v55_v8 = vld [vmem:[%s306_s1] sm:$0xff]  ;;  %s144_s13 = sld [smem:[#allocation6 + $0x1]]  ;;  %s130_s23 = sshll.u32 %s310_s5, 4  ;;  %s131_s23 = int_to_ptr.hbm [resolvable:$true] %s130_s23 }
  0x10   :  { %v152_v10 = vld [vmem:[%s309_s4] ss:$0 sm:$0xff]  ;;  %v154_v28 = vld [vmem:[%s309_s4 + $0x1] ss:$0 sm:$0xff]  ;;  %v155_v32 = vld [vmem:[%s307_s2 + $0x2] ss:$0 sm:$0xff] }
  0x11   :  { %v62_v4 = vsel %vm61_vm0, %v59_v2, 0.0  ;;  %v66_v6 = vsel %vm65_vm1, %v60_v5, 0.0  ;;  %s145_s17 = sld [smem:[#allocation6 + $0x2]]  ;;  %v156_v45 = vld [vmem:[%s309_s4 + $0x2] ss:$0 sm:$0xff]  ;;  %s227_s2 = smov [#allocation7]  }
  0x12   :  { %63 = vadd.xlane.f32.xlu0 %v62_v4  ;;  %s128_s20 = sshll.u32 %s227_s2, 4  ;;  %s129_s20 = int_to_ptr.vmem [resolvable:$true] %s128_s20 }
  0x13   :  { %v69_v7 = vstv %s50_s3 }
  0x15   :  { %v90_v26 = vstv %s144_s13 }
  0x17   :  { %v111_v43 = vstv %s145_s17 }
  0x1a   :  { %67 = vadd.xlane.f32.xlu0 %v66_v6 }
  0x85   :  { %v64_v9 = vpop.xlane.xlu0 %63 }
  0x86   :  { %v70_v11 = vadd.f32 %v69_v7, %v64_v9 }
  0x88   :  { %v73_v12 = vmul.f32 %v70_v11, %v55_v8 }
  0x8a   :  { %v76_v13 = vadd.f32 %v152_v10, %v73_v12 }
  0x8c   :  { %v78_v15 = vadd.f32 %v76_v13, %v53_v0 }
  0x8d   :  { %v68_v17 = vpop.xlane.xlu0 %67 }
  0x8e   :  { %v71_v18 = vadd.f32 %v69_v7, %v68_v17  ;;  %v82_v19 = vmul.f32 %v153_v14, %v78_v15 }
  0x90   :  { %v74_v20 = vmul.f32 %v71_v18, %v56_v16  ;;  %v84_v21 = vsel %vm61_vm0, %v82_v19, 0.0 }
  0x91   :  { %85 = vadd.xlane.f32.xlu1 %v84_v21 }
  0x92   :  { %v77_v22 = vadd.f32 %v152_v10, %v74_v20 }
  0x94   :  { %v79_v23 = vadd.f32 %v77_v22, %v54_v3 }
  0x96   :  { %v83_v24 = vmul.f32 %v153_v14, %v79_v23 }
  0x98   :  { %v87_v25 = vsel %vm65_vm1, %v83_v24, 0.0 }
  0x99   :  { %88 = vadd.xlane.f32.xlu1 %v87_v25 }
 0x104   :  { %v86_v27 = vpop.xlane.xlu1 %85 }
 0x105   :  { %v91_v29 = vadd.f32 %v90_v26, %v86_v27 }
 0x107   :  { %v94_v30 = vmul.f32 %v91_v29, %v55_v8 }
 0x109   :  { %v97_v31 = vadd.f32 %v154_v28, %v94_v30 }
 0x10b   :  { %v99_v33 = vadd.f32 %v97_v31, %v78_v15 }
 0x10c   :  { %v89_v34 = vpop.xlane.xlu1 %88 }
 0x10d   :  { %v92_v35 = vadd.f32 %v90_v26, %v89_v34  ;;  %v103_v36 = vmul.f32 %v155_v32, %v99_v33 }
 0x10f   :  { %v95_v37 = vmul.f32 %v92_v35, %v56_v16  ;;  %v105_v38 = vsel %vm61_vm0, %v103_v36, 0.0 }
 0x110   :  { %106 = vadd.xlane.f32.xlu2 %v105_v38 }
 0x111   :  { %v98_v39 = vadd.f32 %v154_v28, %v95_v37 }
 0x113   :  { %v100_v40 = vadd.f32 %v98_v39, %v79_v23 }
 0x115   :  { %v104_v41 = vmul.f32 %v155_v32, %v100_v40 }
 0x117   :  { %v108_v42 = vsel %vm65_vm1, %v104_v41, 0.0 }
 0x118   :  { %109 = vadd.xlane.f32.xlu2 %v108_v42 }
 0x183   :  { %v107_v44 = vpop.xlane.xlu2 %106 }
 0x184   :  { %v112_v46 = vadd.f32 %v111_v43, %v107_v44 }
 0x186   :  { %v115_v47 = vmul.f32 %v112_v46, %v55_v8 }
 0x188   :  { %v118_v48 = vadd.f32 %v156_v45, %v115_v47 }
 0x18a   :  { %v120_v49 = vadd.f32 %v118_v48, %v99_v33 }
 0x18b   :  { %v110_v50 = vpop.xlane.xlu2 %109 }
 0x18c   :  { %v113_v51 = vadd.f32 %v111_v43, %v110_v50  ;;  %122 = vst.msk [vmem:[#allocation7] sm:$0xff] %vm61_vm0, %v120_v49 }
 0x18e   :  { %v116_v52 = vmul.f32 %v113_v51, %v56_v16 }
 0x190   :  { %v119_v53 = vadd.f32 %v156_v45, %v116_v52 }
 0x192   :  { %v121_v54 = vadd.f32 %v119_v53, %v100_v40 }
 0x194   :  { %123 = vst.msk [vmem:[#allocation7 + $0x8] sm:$0x3] %vm65_vm1, %v121_v54 }
 0x195   :  { %136 = dma.vmem_to_hbm [thread:$0]  %s129_s20, 256, %s131_s23, [#allocation4], %s224_s26, %s224_s26, %s225_s27  }
 0x196   :  { %221 = dma.done.wait [#allocation4], 256  }
 0x197   :  { %222 = vsyncadd [#allocation4], 4294967040 }
 0x198   :  { %141 = vsyncpa [#allocation3], 1 }
 0x199   :  { %142 = vsyncpa [#allocation4], 1 }
 0x19a   :  { %143 = vsyncpa [#allocation5], 1 }

</bundles_post_ra>
